<compile_context>
chip_gen: v7x
topology: tpu7x:2x2x1
jax: 0.10.0
libtpu: 0.0.40
codegen_flags: <defaults>
</compile_context>

<pallas_src>
import math

import jax
import jax.numpy as jnp
from jax import lax
from jax.experimental import pallas as pl
from jax.experimental.pallas import tpu as pltpu

# Full-f32 matmuls everywhere (kernel and XLA reference) so the self-check can
# use a tight tolerance.
jax.config.update("jax_default_matmul_precision", "highest")

BB = 8  # samples processed per grid step


# ----------------------------- kernel helpers ------------------------------

def _leaky(v):
    return jnp.where(v > 0, v, 0.2 * v)


def _conv3_fused(x, wf, bs):
    """Fused 3-tap Conv1d (BN folded) on a sublane-stacked feature map.

    x : (R, L)   rows are sample-major (sample, channel) pairs
    wf: (Ro, 3R) block-diagonal fused weight
    bs: (Ro, 1)  per-row bias
    """
    z = jnp.zeros_like(x[:, :1])
    x_lm1 = jnp.concatenate([z, x[:, :-1]], axis=1)   # tap 0: x[l-1]
    x_lp1 = jnp.concatenate([x[:, 1:], z], axis=1)    # tap 2: x[l+1]
    s = jnp.concatenate([x_lm1, x, x_lp1], axis=0)    # (3R, L)
    return jnp.dot(wf, s, preferred_element_type=jnp.float32) + bs


# ------------------------------ Pallas kernels ------------------------------

def decoder_kernel(a_ref, w6, b6, w7, b7, w8, b8, out_ref):
    """Batch-invariant decoder branch: A (1,32) -> (32,32). Runs once."""
    a = a_ref[...]                                               # (1, 32)
    a = _leaky(_conv3_fused(a, w6[...], b6[...]))                # (16, 32)
    a = _leaky(_conv3_fused(a, w7[...], b7[...]))                # (32, 32)
    a = _leaky(jnp.dot(w8[...], a,
                       preferred_element_type=jnp.float32) + b8[...])   # (32, 32)
    out_ref[...] = a


def gcn_block_kernel(x_ref, p1_ref, p2_ref, adec_ref,
                     wf1, bs1, wf2, bs2, wf3, bs3, wf4, bs4, wf5, bs5,
                     wf9, bs9, l1w, l1b, l2w, l2b, out_ref):
    """Processes a block of BB samples, feature maps stacked along sublanes."""
    h = x_ref[:, 0, :]                                           # (BB, L)
    # ---- processing ----
    h = _leaky(_conv3_fused(h, wf1[...], bs1[...]))              # (BB*4, L)
    h = _leaky(_conv3_fused(h, wf2[...], bs2[...]))              # (BB*8, L)
    h = jnp.dot(h, p1_ref[...],
                preferred_element_type=jnp.float32)              # pool -> (BB*8, 128)
    # ---- encoder ----
    h = _leaky(_conv3_fused(h, wf3[...], bs3[...]))              # (BB*4, 128)
    h = _leaky(_conv3_fused(h, wf4[...], bs4[...]))              # (BB*4, 128)
    h = _leaky(_conv3_fused(h, wf5[...], bs5[...]))              # (BB*4, 128)
    h = jnp.dot(h, p2_ref[...],
                preferred_element_type=jnp.float32)              # pool -> (BB*4, 32)
    # ---- graph matmul: x @ A_dec (shared right operand) ----
    h = jnp.dot(h, adec_ref[...],
                preferred_element_type=jnp.float32)              # (BB*4, 32)
    # ---- classification ----
    h = _leaky(_conv3_fused(h, wf9[...], bs9[...]))              # (BB, 32)
    h = _leaky(jnp.dot(h, l1w[...],
                       preferred_element_type=jnp.float32) + l1b[...])   # (BB, 16)
    out_ref[...] = jnp.dot(h, l2w[...],
                           preferred_element_type=jnp.float32) + l2b[...]  # (BB, 128)


# ----------------------------- parameter setup ------------------------------

def init_conv_bn(key, co, ci, k):
    """Conv1d weights + eval-mode BatchNorm1d, folded into (w, b)."""
    ks = jax.random.split(key, 6)
    w = jax.random.normal(ks[0], (co, ci, k), jnp.float32) / math.sqrt(ci * k)
    b = 0.1 * jax.random.normal(ks[1], (co,), jnp.float32)
    gamma = jax.random.uniform(ks[2], (co,), jnp.float32, minval=0.5, maxval=1.5)
    beta = 0.1 * jax.random.normal(ks[3], (co,), jnp.float32)
    rmean = 0.1 * jax.random.normal(ks[4], (co,), jnp.float32)
    rvar = jax.random.uniform(ks[5], (co,), jnp.float32, minval=0.5, maxval=1.5)
    scale = gamma / jnp.sqrt(rvar + 1e-5)
    return w * scale[:, None, None], (b - rmean) * scale + beta


def init_linear(key, out_f, in_f):
    k1, k2 = jax.random.split(key)
    w = jax.random.normal(k1, (out_f, in_f), jnp.float32) / math.sqrt(in_f)
    b = 0.1 * jax.random.normal(k2, (out_f,), jnp.float32)
    return w, b


def init_params(key):
    keys = jax.random.split(key, 11)
    conv_cfg = [(4, 1, 3), (8, 4, 3),                    # processing
                (4, 8, 3), (4, 4, 3), (4, 4, 3),         # encoder
                (16, 1, 3), (32, 16, 3), (32, 32, 1),    # decoder
                (1, 4, 3)]                               # classification conv
    convs = [init_conv_bn(keys[i], *cfg) for i, cfg in enumerate(conv_cfg)]
    l1 = init_linear(keys[9], 16, 32)
    l2 = init_linear(keys[10], 3, 16)
    A = jnp.ones((1, 1, 32), jnp.float32)                # nn.Parameter(torch.ones(1,1,32))
    return convs, l1, l2, A


def adaptive_pool_matrix(lin, lout):
    """P such that (C, lin) @ P == AdaptiveAvgPool1d(lout) output (C, lout)."""
    i = jnp.arange(lin)[:, None]
    j = jnp.arange(lout)[None, :]
    start = (j * lin) // lout
    end = ((j + 1) * lin + lout - 1) // lout
    return jnp.where((i >= start) & (i < end),
                     1.0 / (end - start), 0.0).astype(jnp.float32)


def fuse_conv_block(w, b, nb):
    """Fold a (Co, Ci, K) conv into a block-diag fused weight for nb samples.

    Returns wf (nb*Co, K*nb*Ci) and bs (nb*Co, 1) such that, with the shifted
    sublane stack S = [x[l-1]; x[l]; x[l+1]] of a (nb*Ci, L) map,
    wf @ S + bs == per-sample Conv1d(k=K, pad=K//2) output stacked as (nb*Co, L).
    """
    co, ci, k = w.shape
    eye = jnp.eye(nb, dtype=w.dtype)
    taps = [jnp.kron(eye, w[:, :, t]) for t in range(k)]   # each (nb*co, nb*ci)
    wf = jnp.concatenate(taps, axis=1)                     # (nb*co, k*nb*ci)
    bs = jnp.tile(b, nb)[:, None]                          # (nb*co, 1)
    return wf, bs


# --------------------------------- wrapper ----------------------------------

def gcn_forward_pallas(x, convs, l1, l2, A):
    n, cin, L = x.shape
    assert cin == 1

    (w1, b1), (w2, b2), (w3, b3), (w4, b4), (w5, b5), \
        (w6, b6), (w7, b7), (w8, b8), (w9, b9) = convs
    (l1w, l1b), (l2w, l2b) = l1, l2

    # ---- batch-invariant decoder branch: computed once, in its own kernel ----
    wf6, bs6 = fuse_conv_block(w6, b6, 1)
    wf7, bs7 = fuse_conv_block(w7, b7, 1)
    a_dec = pl.pallas_call(
        decoder_kernel,
        out_shape=jax.ShapeDtypeStruct((32, 32), jnp.float32),
    )(A.reshape(1, 32), wf6, bs6, wf7, bs7, w8[:, :, 0], b8[:, None])

    # ---- block-diagonal fused conv weights for BB stacked samples ----
    blocked = [fuse_conv_block(w, b, BB)
               for (w, b) in ((w1, b1), (w2, b2), (w3, b3),
                              (w4, b4), (w5, b5), (w9, b9))]

    # Shared adaptive-avg-pool matrices (DMA'd once; block index never changes).
    p1 = adaptive_pool_matrix(L, 128)
    p2 = adaptive_pool_matrix(128, 32)

    # Linear layers; last one zero-padded to 128 output lanes -> lane-dense store.
    l1w_t = l1w.T                                    # (32, 16)
    l1b_r = l1b[None, :]                             # (1, 16)
    l2w_p = jnp.zeros((16, 128), jnp.float32).at[:, :3].set(l2w.T)
    l2b_p = jnp.zeros((1, 128), jnp.float32).at[:, :3].set(l2b[None, :])

    # Pad the batch up to a multiple of BB.
    n_pad = (-n) % BB
    if n_pad:
        x = jnp.concatenate([x, jnp.zeros((n_pad, 1, L), x.dtype)], axis=0)
    n_tot = n + n_pad

    inputs = [x, p1, p2, a_dec]
    for wf, bs in blocked:
        inputs += [wf, bs]
    inputs += [l1w_t, l1b_r, l2w_p, l2b_p]

    def const_spec(arr):
        nd = arr.ndim
        return pl.BlockSpec(arr.shape, lambda i, _nd=nd: (0,) * _nd)

    in_specs = ([pl.BlockSpec((BB, 1, L), lambda i: (i, 0, 0))] +
                [const_spec(a) for a in inputs[1:]])

    out = pl.pallas_call(
        gcn_block_kernel,
        out_shape=jax.ShapeDtypeStruct((n_tot, 128), jnp.float32),
        grid_spec=pltpu.PrefetchScalarGridSpec(
            num_scalar_prefetch=0,
            grid=(n_tot // BB,),
            in_specs=in_specs,
            out_specs=pl.BlockSpec((BB, 128), lambda i: (i, 0)),
        ),
        compiler_params=pltpu.CompilerParams(dimension_semantics=("parallel",)),
    )(*inputs)

    return jnp.squeeze(out[:n, :3])        # mirrors torch's x.squeeze()


# ----------------------- pure-JAX reference (checking) -----------------------

def gcn_forward_ref(x, convs, l1, l2, A):
    def conv1d(h, w, b, pad):
        y = lax.conv_general_dilated(h, w, window_strides=(1,), padding=[(pad, pad)],
                                     dimension_numbers=("NCH", "OIH", "NCH"))
        return y + b[None, :, None]

    def pool(h, lout):
        n, c, lin = h.shape
        return h.reshape(n, c, lout, lin // lout).mean(axis=-1)

    lr = lambda v: jnp.where(v > 0, v, 0.2 * v)
    (w1, b1), (w2, b2), (w3, b3), (w4, b4), (w5, b5), \
        (w6, b6), (w7, b7), (w8, b8), (w9, b9) = convs
    h = lr(conv1d(x, w1, b1, 1)); h = lr(conv1d(h, w2, b2, 1)); h = pool(h, 128)
    h = lr(conv1d(h, w3, b3, 1)); h = lr(conv1d(h, w4, b4, 1))
    h = lr(conv1d(h, w5, b5, 1)); h = pool(h, 32)
    a = lr(conv1d(A, w6, b6, 1)); a = lr(conv1d(a, w7, b7, 1)); a = lr(conv1d(a, w8, b8, 0))
    h = jnp.matmul(h, a)                       # (N,4,32) @ (1,32,32)
    h = lr(conv1d(h, w9, b9, 1))               # (N,1,32)
    (lw1, lb1), (lw2, lb2) = l1, l2
    h = lr(jnp.matmul(h, lw1.T) + lb1)
    h = jnp.matmul(h, lw2.T) + lb2
    return jnp.squeeze(h)


# ----------------------------------- main ------------------------------------

if __name__ == "__main__":
    key = jax.random.PRNGKey(0)
    pkey, xkey = jax.random.split(key)
    convs, l1, l2, A = init_params(pkey)

    N, L = 16, 256                     # input: (N, 1, L), NCL like PyTorch
    x = jax.random.normal(xkey, (N, 1, L), jnp.float32)

    out = jax.block_until_ready(gcn_forward_pallas(x, convs, l1, l2, A))
    ref = jax.block_until_ready(gcn_forward_ref(x, convs, l1, l2, A))

    assert out.shape == (N, 3), out.shape
    max_err = float(jnp.max(jnp.abs(out - ref)))
    assert max_err < 1e-3, f"kernel/reference mismatch, max abs err = {max_err}"
    print("KERNEL_OK")
</pallas_src>

<mosaic_0001>
module attributes {stable_mosaic.version = 11 : i64} {
  func.func @decoder_kernel(%arg0: memref<1x32xf32, #tpu.memory_space<vmem>>, %arg1: memref<16x3xf32, #tpu.memory_space<vmem>>, %arg2: memref<16x1xf32, #tpu.memory_space<vmem>>, %arg3: memref<32x48xf32, #tpu.memory_space<vmem>>, %arg4: memref<32x1xf32, #tpu.memory_space<vmem>>, %arg5: memref<32x32xf32, #tpu.memory_space<vmem>>, %arg6: memref<32x1xf32, #tpu.memory_space<vmem>>, %arg7: memref<32x32xf32, #tpu.memory_space<vmem>>) attributes {dimension_semantics = [], scalar_prefetch = 0 : i64, scratch_operands = 0 : i64, tpu.core_type = #tpu.core_type<tc>} {
    %c0 = arith.constant 0 : index
    %c0_0 = arith.constant 0 : index
    %0 = vector.load %arg0[%c0, %c0_0] : memref<1x32xf32, #tpu.memory_space<vmem>>, vector<1x32xf32>
    %c0_1 = arith.constant 0 : index
    %c0_2 = arith.constant 0 : index
    %1 = vector.load %arg1[%c0_1, %c0_2] : memref<16x3xf32, #tpu.memory_space<vmem>>, vector<16x3xf32>
    %c0_3 = arith.constant 0 : index
    %c0_4 = arith.constant 0 : index
    %2 = vector.load %arg2[%c0_3, %c0_4] : memref<16x1xf32, #tpu.memory_space<vmem>>, vector<16x1xf32>
    %cst = arith.constant 0.000000e+00 : f32
    %3 = vector.broadcast %cst : f32 to vector<1x1xf32>
    %4 = vector.extract_strided_slice %0 {offsets = [0, 0], sizes = [1, 31], strides = [1, 1]} : vector<1x32xf32> to vector<1x31xf32>
    %5 = tpu.concatenate %3, %4 in 1 : vector<1x1xf32>, vector<1x31xf32> -> vector<1x32xf32>
    %6 = vector.extract_strided_slice %0 {offsets = [0, 1], sizes = [1, 31], strides = [1, 1]} : vector<1x32xf32> to vector<1x31xf32>
    %7 = tpu.concatenate %6, %3 in 1 : vector<1x31xf32>, vector<1x1xf32> -> vector<1x32xf32>
    %8 = tpu.concatenate %5, %0, %7 in 0 : vector<1x32xf32>, vector<1x32xf32>, vector<1x32xf32> -> vector<3x32xf32>
    %cst_5 = arith.constant dense<0.000000e+00> : vector<16x32xf32>
    %9 = tpu.matmul %1, %8, %cst_5 {dimension_numbers = #tpu.dot_dimension_numbers<[1], [0], [0], [1], [0, 0, 1, 1], [], []>, precision = #tpu.contract_precision<fp32>} : vector<16x3xf32>, vector<3x32xf32>, vector<16x32xf32> -> vector<16x32xf32>
    %10 = vector.broadcast %2 : vector<16x1xf32> to vector<16x32xf32>
    %11 = arith.addf %9, %10 : vector<16x32xf32>
    %cst_6 = arith.constant 0.000000e+00 : f32
    %12 = vector.broadcast %cst_6 : f32 to vector<16x32xf32>
    %13 = arith.cmpf ogt, %11, %12 : vector<16x32xf32>
    %cst_7 = arith.constant 2.000000e-01 : f32
    %14 = vector.broadcast %cst_7 : f32 to vector<16x32xf32>
    %15 = arith.mulf %14, %11 : vector<16x32xf32>
    %16 = arith.select %13, %11, %15 : vector<16x32xi1>, vector<16x32xf32>
    %c0_8 = arith.constant 0 : index
    %c0_9 = arith.constant 0 : index
    %17 = vector.load %arg3[%c0_8, %c0_9] : memref<32x48xf32, #tpu.memory_space<vmem>>, vector<32x48xf32>
    %c0_10 = arith.constant 0 : index
    %c0_11 = arith.constant 0 : index
    %18 = vector.load %arg4[%c0_10, %c0_11] : memref<32x1xf32, #tpu.memory_space<vmem>>, vector<32x1xf32>
    %cst_12 = arith.constant 0.000000e+00 : f32
    %19 = vector.broadcast %cst_12 : f32 to vector<16x1xf32>
    %20 = vector.extract_strided_slice %16 {offsets = [0, 0], sizes = [16, 31], strides = [1, 1]} : vector<16x32xf32> to vector<16x31xf32>
    %21 = tpu.concatenate %19, %20 in 1 : vector<16x1xf32>, vector<16x31xf32> -> vector<16x32xf32>
    %22 = vector.extract_strided_slice %16 {offsets = [0, 1], sizes = [16, 31], strides = [1, 1]} : vector<16x32xf32> to vector<16x31xf32>
    %23 = tpu.concatenate %22, %19 in 1 : vector<16x31xf32>, vector<16x1xf32> -> vector<16x32xf32>
    %24 = tpu.concatenate %21, %16, %23 in 0 : vector<16x32xf32>, vector<16x32xf32>, vector<16x32xf32> -> vector<48x32xf32>
    %cst_13 = arith.constant dense<0.000000e+00> : vector<32x32xf32>
    %25 = tpu.matmul %17, %24, %cst_13 {dimension_numbers = #tpu.dot_dimension_numbers<[1], [0], [0], [1], [0, 0, 1, 1], [], []>, precision = #tpu.contract_precision<fp32>} : vector<32x48xf32>, vector<48x32xf32>, vector<32x32xf32> -> vector<32x32xf32>
    %26 = vector.broadcast %18 : vector<32x1xf32> to vector<32x32xf32>
    %27 = arith.addf %25, %26 : vector<32x32xf32>
    %cst_14 = arith.constant 0.000000e+00 : f32
    %28 = vector.broadcast %cst_14 : f32 to vector<32x32xf32>
    %29 = arith.cmpf ogt, %27, %28 : vector<32x32xf32>
    %cst_15 = arith.constant 2.000000e-01 : f32
    %30 = vector.broadcast %cst_15 : f32 to vector<32x32xf32>
    %31 = arith.mulf %30, %27 : vector<32x32xf32>
    %32 = arith.select %29, %27, %31 : vector<32x32xi1>, vector<32x32xf32>
    %c0_16 = arith.constant 0 : index
    %c0_17 = arith.constant 0 : index
    %33 = vector.load %arg5[%c0_16, %c0_17] : memref<32x32xf32, #tpu.memory_space<vmem>>, vector<32x32xf32>
    %cst_18 = arith.constant dense<0.000000e+00> : vector<32x32xf32>
    %34 = tpu.matmul %33, %32, %cst_18 {dimension_numbers = #tpu.dot_dimension_numbers<[1], [0], [0], [1], [0, 0, 1, 1], [], []>, precision = #tpu.contract_precision<fp32>} : vector<32x32xf32>, vector<32x32xf32>, vector<32x32xf32> -> vector<32x32xf32>
    %c0_19 = arith.constant 0 : index
    %c0_20 = arith.constant 0 : index
    %35 = vector.load %arg6[%c0_19, %c0_20] : memref<32x1xf32, #tpu.memory_space<vmem>>, vector<32x1xf32>
    %36 = vector.broadcast %35 : vector<32x1xf32> to vector<32x32xf32>
    %37 = arith.addf %34, %36 : vector<32x32xf32>
    %cst_21 = arith.constant 0.000000e+00 : f32
    %38 = vector.broadcast %cst_21 : f32 to vector<32x32xf32>
    %39 = arith.cmpf ogt, %37, %38 : vector<32x32xf32>
    %cst_22 = arith.constant 2.000000e-01 : f32
    %40 = vector.broadcast %cst_22 : f32 to vector<32x32xf32>
    %41 = arith.mulf %40, %37 : vector<32x32xf32>
    %42 = arith.select %39, %37, %41 : vector<32x32xi1>, vector<32x32xf32>
    %c0_23 = arith.constant 0 : index
    %c0_24 = arith.constant 0 : index
    %43 = vector.load %arg7[%c0_23, %c0_24] : memref<32x32xf32, #tpu.memory_space<vmem>>, vector<32x32xf32>
    tpu.vector_store %arg7[%c0_23, %c0_24], %42 {strides = array<i32>} : memref<32x32xf32, #tpu.memory_space<vmem>>, vector<32x32xf32>,
    return
  }
}

</mosaic_0001>

<bundles_post_ra>
// kernel: tpu_custom_call.1
= control target key start
LH: loop header
LB: loop body
LE: loop exit
PB: predicated region body
PF: predicated region fallthrough
CT: control target
= control target key end

     0   :  { %s2530_s26 = smov 127   ;;  %vm65_vm0 = vcmask 23552   ;;  %s2848_s0 = inlined_call_operand.vmem [shape: f32[1,32], index: 0, kind: input, shape index: {}]   ;;  %s2849_s1 = inlined_call_operand.vmem [shape: f32[16,3], index: 1, kind: input, shape index: {}]   ;;  %s2850_s2 = inlined_call_operand.vmem [shape: f32[16,1], index: 2, kind: input, shape index: {}]   ;;  %s2851_s3 = inlined_call_operand.vmem [shape: f32[32,48], index: 3, kind: input, shape index: {}]   ;;  %s2852_s4 = inlined_call_operand.vmem [shape: f32[32,1], index: 4, kind: input, shape index: {}]   ;;  %s2853_s5 = inlined_call_operand.vmem [shape: f32[32,32], index: 5, kind: input, shape index: {}]   ;;  %s2854_s6 = inlined_call_operand.vmem [shape: f32[32,1], index: 6, kind: input, shape index: {}]   ;;  %s2855_s7 = inlined_call_operand.hbm [shape: f32[32,32], index: 7, kind: output, shape index: {}]  }
   0x1   :  { %v1969_v0 = vld [vmem:[%s2848_s0] ss:$0 sm:$0xff] }
   0x2   :  { %42 = vrot.lane.b32.xlu0 %v1969_v0, %s2530_s26  ;;  %v28_v1 = vld [vmem:[%s2849_s1] sm:$0xff] }
   0x3   :  { %v67_v2 = vsel %vm65_vm0, %v28_v1, 0 }
   0x4   :  { %12 = vsyncpa [#allocation3], 0  ;;  %v142_v3 = vand.u32 4294901760, %v67_v2  ;;  %s2531_s29 = smov 1   ;;  %v30_v8 = vld [vmem:[%s2850_s2] sm:$0xff]  ;;  %v2532_v9 = vmov 0  }
   0x5   :  { %2504 = vset.pattern.permute.xlu1 %v2532_v9  ;;  %2505 = vset.pattern.permute.xlu0 %v2532_v9  ;;  %v31_v10 = vld [vmem:[%s2850_s2 + $0x8] sm:$0xff]  ;;  %vm45_vm1 = vcmask 252928   ;;  %vm40_vm2 = vcmask 7168   ;;  %vm51_vm3 = vcmask 1040384   ;;  %vm53_vm4 = vcmask 1041408   ;;  %v571_v34 = vld [vmem:[%s2851_s3] sm:$0xff] }
   0x6   :  { %37 = vrot.lane.b32.xlu0 %v1969_v0, %s2531_s29  ;;  %v143_v4 = vsub.f32 %v67_v2, %v142_v3  ;;  %57 = vperm.xlu1 %2504, %v30_v8   ;;  %v29_v11 = vld [vmem:[%s2849_s1 + $0x8] sm:$0xff]  ;;  %vm72_vm5 = vcmask 1042432   ;;  %vm617_vm6 = vcmask 392192   ;;  %v577_v61 = vld [vmem:[%s2852_s4 + $0x10] sm:$0xff]  ;;  %v575_v2 = vld [vmem:[%s2852_s4] sm:$0xff]  ;;  %vm1310_vm9 = vcmask 261120  }
   0x7   :  { %v70_v12 = vsel %vm65_vm0, %v29_v11, 0  ;;  %v619_v37 = vsel %vm617_vm6, %v571_v34, 0  ;;  %v576_v54 = vld [vmem:[%s2852_s4 + $0x8] sm:$0xff]  ;;  %v1288_v1 = vld [vmem:[%s2854_s6 + $0x10] sm:$0xff]  ;;  %v574_v9 = vld [vmem:[%s2851_s3 + $0x18] sm:$0xff] }
   0x8   :  { %v144_v5 = vand.u32 4294901760, %v143_v4  ;;  %v152_v13 = vand.u32 4294901760, %v70_v12  ;;  %v2601_v39 = vand.u32 4294901760, %v619_v37  ;;  %v573_v8 = vld [vmem:[%s2851_s3 + $0x10] sm:$0xff] }
   0x9   :  { %v625_v11 = vsel %vm617_vm6, %v573_v8, 0 }
   0xa   :  { %v145_v6 = vsub.f32 %v143_v4, %v144_v5  ;;  %62 = vperm.xlu1 %2504, %v31_v10   ;;  %v153_v14 = vsub.f32 %v70_v12, %v152_v13  ;;  %v2604_v42 = vsub.f32 %v619_v37, %v2601_v39  ;;  %v628_v12 = vsel %vm617_vm6, %v574_v9, 0 }
   0xc   :  { %v146_v7 = vand.u32 4294901760, %v145_v6  ;;  %v154_v16 = vand.u32 4294901760, %v153_v14  ;;  %v703_v46 = vand.u32 4294901760, %v2604_v42  ;;  %v572_v6 = vld [vmem:[%s2851_s3 + $0x8] sm:$0xff] }
   0xe   :  { %2098 = vmatprep.mubr.f32.mxu0 %v146_v7  ;;  %v155_v21 = vsub.f32 %v153_v14, %v154_v16  ;;  %v704_v49 = vsub.f32 %v2604_v42, %v703_v46  ;;  %v622_v7 = vsel %vm617_vm6, %v572_v6, 0  ;;  %v1283_v6 = vld [vmem:[%s2853_s5 + $0x8] sm:$0xff] }
   0xf   :  { %v2656_v10 = vand.u32 4294901760, %v622_v7  ;;  %v1315_v8 = vsel %vm1310_vm9, %v1283_v6, 0 }
  0x10   :  { %v156_v26 = vand.u32 4294901760, %v155_v21  ;;  %v705_v52 = vand.u32 4294901760, %v704_v49 }
  0x12   :  { %2138 = vmatprep.mubr.f32.mxu1 %v705_v52 }
  0x74   :  { %v43_v15 = vpop.permute.xlu0 %42 }
  0x75   :  { %v46_v17 = vsel %vm45_vm1, %v43_v15, 0.0 }
  0x76   :  { %v49_v19 = vrot.slane %v46_v17, 6  ;;  %v2664_v17 = vsub.f32 %v622_v7, %v2656_v10  ;;  %v1284_v7 = vld [vmem:[%s2853_s5 + $0x10] sm:$0xff] }
  0x77   :  { %v1318_v9 = vsel %vm1310_vm9, %v1284_v7, 0 }
  0x78   :  { %v38_v18 = vpop.permute.xlu0 %37 }
  0x79   :  { %v41_v20 = vsel %vm40_vm2, 0.0, %v38_v18 }
  0x7a   :  { %v52_v22 = vsel %vm51_vm3, %v41_v20, %v1969_v0  ;;  %v1286_v0 = vld [vmem:[%s2854_s6] sm:$0xff]  ;;  %v2667_v20 = vand.u32 4294901760, %v628_v12 }
  0x7b   :  { %v54_v23 = vsel %vm53_vm4, %v52_v22, %v49_v19 }
  0x7c   :  { %v74_v24 = vsel %vm72_vm5, %v54_v23, 0 }
  0x7d   :  { %v77_v25 = vand.u32 4294901760, %v74_v24 }
  0x7f   :  { %v164_v27 = vsub.f32 %v74_v24, %v77_v25  ;;  %2096 = vmatprep.subr.mxu0 %v77_v25 }
  0x80   :  { %2097 = vmatpush3.msra.mxu0 %v77_v25 }
  0x81   :  { %2099 = vmatmul.mubr.f32.vlgmr.msra.gmra.mrb[0].mxu0 %v156_v26  ;;  %v165_v28 = vand.u32 4294901760, %v164_v27 }
  0x82   :  { %2103 = vmatprep.mubr.f32.mxu0 %v142_v3 }
  0x83   :  { %v166_v29 = vsub.f32 %v164_v27, %v165_v28 }
  0x85   :  { %v167_v30 = vand.u32 4294901760, %v166_v29  ;;  %v58_v31 = vpop.permute.xlu1 %57  ;;  %v713_v29 = vand.u32 4294901760, %v2664_v17 }
  0x87   :  { %2101 = vmatprep.subr.mxu0 %v167_v30 }
  0x88   :  { %2102 = vmatpush3.msra.mxu0 %v167_v30 }
  0x89   :  { %2104 = vmatmul.mubr.f32.vlgmr.msra.gmra.mrb[0].mxu0 %v152_v13  ;;  %2106 = vmatprep.subr.mxu0 %v164_v27  ;;  %v63_v32 = vpop.permute.xlu1 %62 }
  0x8a   :  { %2107 = vmatpush3.msra.mxu0 %v164_v27  ;;  %2108 = vmatprep.mubr.f32.mxu0 %v143_v4  ;;  %v1287_v4 = vld [vmem:[%s2854_s6 + $0x8] sm:$0xff] }
  0x8b   :  { %2111 = vmatprep.subr.mxu0 %v77_v25 }
  0x91   :  { %2109 = vmatmul.mubr.f32.vlgmr.msra.gmra.mrb[0].mxu0 %v153_v14  ;;  %v2660_v14 = vand.u32 4294901760, %v625_v11 }
  0x92   :  { %2112 = vmatpush3.msra.mxu0 %v77_v25  ;;  %2113 = vmatprep.mubr.f32.mxu0 %v144_v5  ;;  %v1289_v5 = vld [vmem:[%s2854_s6 + $0x18] sm:$0xff] }
  0x93   :  { %2116 = vmatprep.subr.mxu0 %v165_v28  ;;  %v2672_v24 = vsub.f32 %v625_v11, %v2660_v14 }
  0x99   :  { %2114 = vmatmul.mubr.f32.vlgmr.msra.gmra.mrb[0].mxu0 %v154_v16 }
  0x9a   :  { %2117 = vmatpush3.msra.mxu0 %v165_v28  ;;  %2118 = vmatprep.mubr.f32.mxu0 %v142_v3 }
  0x9b   :  { %2121 = vmatprep.subr.mxu0 %v77_v25 }
  0xa1   :  { %2119 = vmatmul.mubr.f32.vlgmr.msra.gmra.mrb[0].mxu0 %v152_v13 }
  0xa2   :  { %2122 = vmatpush3.msra.mxu0 %v77_v25  ;;  %2123 = vmatprep.mubr.f32.mxu0 %v142_v3  ;;  %v578_v3 = vld [vmem:[%s2852_s4 + $0x18] sm:$0xff] }
  0xa9   :  { %2124 = vmatmul.mubr.f32.vlgmr.msra.gmra.mrb[0].mxu0 %v152_v13 }
 0x17c   :  { %v2125_v33 = vpop.f32.mrb[0].mxu0 }
 0x17d   :  { %v2438_v35 = vadd.f32 %v2125_v33, %v63_v32  ;;  %v555_v36 = vpop.f32.mrb[1].mxu0  ;;  %v2683_v33 = vsub.f32 %v628_v12, %v2667_v20  ;;  %v2776_v12 = vand.u32 4294901760, %v1315_v8 }
 0x17e   :  { %v2439_v38 = vadd.f32 %v555_v36, %v58_v31 }
 0x17f   :  { %vm566_vm7 = vcmp.gt.f32.partialorder %v2438_v35, 0.0  ;;  %v568_v40 = vmul.f32 0.2, %v2438_v35 }
 0x180   :  { %vm565_vm8 = vcmp.gt.f32.partialorder %v2439_v38, 0.0  ;;  %v567_v41 = vmul.f32 0.2, %v2439_v38 }
 0x181   :  { %v570_v43 = vsel %vm566_vm7, %v2438_v35, %v568_v40 }
 0x182   :  { %583 = vrot.lane.b32.xlu1 %v570_v43, %s2531_s29  ;;  %v640_v44 = vand.u32 4294901760, %v570_v43  ;;  %v569_v45 = vsel %vm565_vm8, %v2439_v38, %v567_v41  ;;  %v723_v38 = vand.u32 4294901760, %v2672_v24 }
 0x183   :  { %581 = vrot.lane.b32.xlu0 %v569_v45, %s2531_s29  ;;  %v637_v47 = vand.u32 4294901760, %v569_v45 }
 0x184   :  { %v764_v48 = vsub.f32 %v570_v43, %v640_v44  ;;  %v724_v52 = vsub.f32 %v2672_v24, %v723_v38 }
 0x185   :  { %v2612_v50 = vpack.c.bf16 %v640_v44, %v637_v47  ;;  %v757_v51 = vsub.f32 %v569_v45, %v637_v47  ;;  %v714_v44 = vsub.f32 %v2664_v17, %v713_v29 }
 0x186   :  { %591 = vrot.lane.b32.xlu1 %v570_v43, %s2530_s26  ;;  %v765_v53 = vand.u32 4294901760, %v764_v48 }
 0x187   :  { %589 = vrot.lane.b32.xlu0 %v569_v45, %s2530_s26  ;;  %v758_v55 = vand.u32 4294901760, %v757_v51  ;;  %v2619_v56 = vpack.c.bf16 %v764_v48, %v757_v51  ;;  %v733_v45 = vand.u32 4294901760, %v2683_v33 }
 0x188   :  { %v766_v57 = vsub.f32 %v764_v48, %v765_v53 }
 0x189   :  { %v759_v58 = vsub.f32 %v757_v51, %v758_v55  ;;  %v2621_v59 = vpack.c.bf16 %v765_v53, %v758_v55  ;;  %v715_v53 = vand.u32 4294901760, %v714_v44 }
 0x18a   :  { %604 = vperm.xlu1 %2504, %v576_v54   ;;  %v767_v60 = vand.u32 4294901760, %v766_v57 }
 0x18b   :  { %v760_v62 = vand.u32 4294901760, %v759_v58  ;;  %599 = vperm.xlu0 %2505, %v575_v2   ;;  %v734_v58 = vsub.f32 %v2683_v33, %v733_v45 }
 0x18d   :  { %v2626_v63 = vpack.c.bf16 %v767_v60, %v760_v62  ;;  %v725_v60 = vand.u32 4294901760, %v724_v52 }
 0x18e   :  { %609 = vperm.xlu1 %2504, %v577_v61  }
 0x18f   :  { %614 = vperm.xlu0 %2505, %v578_v3  }
 0x192   :  { %1292 = vperm.xlu1 %2504, %v1286_v0   ;;  %v735_v0 = vand.u32 4294901760, %v734_v58 }
 0x193   :  { %1297 = vperm.xlu0 %2505, %v1287_v4  }
 0x196   :  { %1302 = vperm.xlu1 %2504, %v1288_v1  }
 0x197   :  { %1307 = vperm.xlu0 %2505, %v1289_v5  }
 0x1f4   :  { %v584_v13 = vpop.permute.xlu1 %583 }
 0x1f5   :  { %v588_v15 = vsel %vm40_vm2, 0.0, %v584_v13  ;;  %v582_v16 = vpop.permute.xlu0 %581 }
 0x1f6   :  { %v634_v18 = vand.u32 4294901760, %v588_v15  ;;  %v587_v19 = vsel %vm40_vm2, 0.0, %v582_v16 }
 0x1f7   :  { %v631_v21 = vand.u32 4294901760, %v587_v19 }
 0x1f8   :  { %v2669_v22 = vsub.f32 %v588_v15, %v634_v18  ;;  %v592_v23 = vpop.permute.xlu1 %591  ;;  %v2778_v15 = vand.u32 4294901760, %v1318_v9 }
 0x1f9   :  { %v2674_v25 = vpack.c.bf16 %v634_v18, %v631_v21  ;;  %v2676_v26 = vsub.f32 %v587_v19, %v631_v21  ;;  %v596_v27 = vsel %vm45_vm1, %v592_v23, 0.0  ;;  %v590_v28 = vpop.permute.xlu0 %589 }
 0x1fa   :  { %v751_v30 = vand.u32 4294901760, %v2669_v22  ;;  %v646_v31 = vand.u32 4294901760, %v596_v27  ;;  %v595_v32 = vsel %vm45_vm1, %v590_v28, 0.0 }
 0x1fb   :  { %v744_v34 = vand.u32 4294901760, %v2676_v26  ;;  %v643_v35 = vand.u32 4294901760, %v595_v32  ;;  %2319 = vmatprep.subr.bf16.mxu1 %v2674_v25  ;;  %v2342_v2 = vpack.c.bf16 %v2669_v22, %v2676_v26 }
 0x1fc   :  { %v752_v36 = vsub.f32 %v2669_v22, %v751_v30  ;;  %v2690_v37 = vsub.f32 %v596_v27, %v646_v31  ;;  %2321 = vmatpush3.bf16.msra.mxu1 %v2674_v25 }
 0x1fd   :  { %v745_v40 = vsub.f32 %v2676_v26, %v744_v34  ;;  %v771_v41 = vsub.f32 %v595_v32, %v643_v35  ;;  %2323 = vmatprep.subr.bf16.mxu1 %v2612_v50  ;;  %v2696_v43 = vpack.c.bf16 %v646_v31, %v643_v35  ;;  %v2787_v26 = vsub.f32 %v1318_v9, %v2778_v15 }
 0x1fe   :  { %v779_v47 = vand.u32 4294901760, %v2690_v37  ;;  %v753_v51 = vand.u32 4294901760, %v752_v36 }
 0x1ff   :  { %v772_v48 = vand.u32 4294901760, %v771_v41  ;;  %v746_v49 = vand.u32 4294901760, %v745_v40  ;;  %v2350_v3 = vpack.c.bf16 %v2690_v37, %v771_v41 }
 0x200   :  { %2325 = vmatpush3.bf16.msra.mxu1 %v2612_v50  ;;  %v780_v54 = vsub.f32 %v2690_v37, %v779_v47 }
 0x201   :  { %2327 = vmatprep.subr.bf16.mxu1 %v2696_v43  ;;  %v773_v55 = vsub.f32 %v771_v41, %v772_v48  ;;  %v2330_v57 = vpack.c.bf16 %v753_v51, %v746_v49  ;;  %v1414_v41 = vand.u32 4294901760, %v2787_v26 }
 0x202   :  { %v781_v62 = vand.u32 4294901760, %v780_v54 }
 0x203   :  { %v774_v61 = vand.u32 4294901760, %v773_v55 }
 0x204   :  { %2329 = vmatpush3.bf16.msra.mxu1 %v2696_v43 }
 0x205   :  { %2331 = vmatprep.subr.bf16.mxu1 %v2330_v57  ;;  %v2338_v1 = vpack.c.bf16 %v781_v62, %v774_v61 }
 0x207   :  { %2139 = vmatmul.mubr.f32.vlgmr.msra.gmra.mrb[0].mxu1 %v715_v53 }
 0x208   :  { %2333 = vmatpush3.bf16.msra.mxu1 %v2330_v57  ;;  %2141 = vmatprep.mubr.f32.mxu1 %v725_v60  ;;  %v1415_v60 = vsub.f32 %v2787_v26, %v1414_v41 }
 0x209   :  { %2335 = vmatprep.subr.bf16.mxu1 %v2626_v63  ;;  %v605_v13 = vpop.permute.xlu1 %604 }
 0x20a   :  { %v600_v11 = vpop.permute.xlu0 %599 }
 0x20b   :  { %2142 = vmatmul.mubr.f32.gmra.mrb[2].mxu1 %v735_v0 }
 0x20c   :  { %2337 = vmatpush3.bf16.msra.mxu1 %v2626_v63  ;;  %2156 = vmatprep.mubr.f32.mxu1 %v2601_v39  ;;  %v2374_v63 = vpack.c.bf16 %v779_v47, %v772_v48 }
 0x20d   :  { %2339 = vmatprep.subr.bf16.mxu1 %v2338_v1  ;;  %v610_v27 = vpop.permute.xlu1 %609 }
 0x20e   :  { %v615_v23 = vpop.permute.xlu0 %614 }
 0x210   :  { %2341 = vmatpush3.bf16.msra.mxu1 %v2338_v1 }
 0x211   :  { %2343 = vmatprep.subr.bf16.mxu1 %v2342_v2 }
 0x213   :  { %2157 = vmatmul.mubr.f32.vlgmr.msra.gmra.mrb[0].mxu1 %v2656_v10 }
 0x214   :  { %2345 = vmatpush3.bf16.msra.mxu1 %v2342_v2  ;;  %2159 = vmatprep.mubr.f32.mxu1 %v2660_v14 }
 0x215   :  { %2347 = vmatprep.subr.bf16.mxu1 %v2619_v56 }
 0x217   :  { %2160 = vmatmul.mubr.f32.gmra.mrb[2].mxu1 %v2667_v20 }
 0x218   :  { %2349 = vmatpush3.bf16.msra.mxu1 %v2619_v56  ;;  %2174 = vmatprep.mubr.f32.mxu1 %v2604_v42  ;;  %v2366_v56 = vpack.c.bf16 %v751_v30, %v744_v34  ;;  %v1282_v42 = vld [vmem:[%s2853_s5] sm:$0xff] }
 0x219   :  { %2351 = vmatprep.subr.bf16.mxu1 %v2350_v3 }
 0x21c   :  { %2353 = vmatpush3.bf16.msra.mxu1 %v2350_v3 }
 0x21d   :  { %2355 = vmatprep.subr.bf16.mxu1 %v2674_v25 }
 0x21f   :  { %2175 = vmatmul.mubr.f32.vlgmr.msra.gmra.mrb[0].mxu1 %v2664_v17 }
 0x220   :  { %2357 = vmatpush3.bf16.msra.mxu1 %v2674_v25  ;;  %2177 = vmatprep.mubr.f32.mxu1 %v2672_v24 }
 0x221   :  { %2359 = vmatprep.subr.bf16.mxu1 %v2612_v50 }
 0x223   :  { %2178 = vmatmul.mubr.f32.gmra.mrb[2].mxu1 %v2683_v33 }
 0x224   :  { %2361 = vmatpush3.bf16.msra.mxu1 %v2612_v50  ;;  %2192 = vmatprep.mubr.f32.mxu1 %v703_v46  ;;  %v1312_v46 = vsel %vm1310_vm9, %v1282_v42, 0 }
 0x225   :  { %2363 = vmatprep.subr.bf16.mxu1 %v2696_v43 }
 0x228   :  { %2365 = vmatpush3.bf16.msra.mxu1 %v2696_v43 }
 0x229   :  { %2367 = vmatprep.subr.bf16.mxu1 %v2366_v56 }
 0x22b   :  { %2193 = vmatmul.mubr.f32.vlgmr.msra.gmra.mrb[0].mxu1 %v713_v29 }
 0x22c   :  { %2369 = vmatpush3.bf16.msra.mxu1 %v2366_v56  ;;  %2195 = vmatprep.mubr.f32.mxu1 %v723_v38 }
 0x22d   :  { %2371 = vmatprep.subr.bf16.mxu1 %v2621_v59 }
 0x22f   :  { %2196 = vmatmul.mubr.f32.gmra.mrb[2].mxu1 %v733_v45 }
 0x230   :  { %2373 = vmatpush3.bf16.msra.mxu1 %v2621_v59  ;;  %2210 = vmatprep.mubr.f32.mxu1 %v2601_v39 }
 0x231   :  { %2375 = vmatprep.subr.bf16.mxu1 %v2374_v63 }
 0x234   :  { %2377 = vmatpush3.bf16.msra.mxu1 %v2374_v63 }
 0x235   :  { %2379 = vmatprep.subr.bf16.mxu1 %v2674_v25 }
 0x237   :  { %2211 = vmatmul.mubr.f32.vlgmr.msra.gmra.mrb[0].mxu1 %v2656_v10 }
 0x238   :  { %2381 = vmatpush3.bf16.msra.mxu1 %v2674_v25  ;;  %2213 = vmatprep.mubr.f32.mxu1 %v2660_v14 }
 0x239   :  { %2383 = vmatprep.subr.bf16.mxu1 %v2612_v50 }
 0x23b   :  { %2214 = vmatmul.mubr.f32.gmra.mrb[2].mxu1 %v2667_v20 }
 0x23c   :  { %2385 = vmatpush3.bf16.msra.mxu1 %v2612_v50  ;;  %2228 = vmatprep.mubr.f32.mxu1 %v2601_v39  ;;  %v2756_v50 = vand.u32 4294901760, %v1312_v46 }
 0x23d   :  { %2387 = vmatprep.subr.bf16.mxu1 %v2696_v43 }
 0x23e   :  { %v2759_v39 = vsub.f32 %v1312_v46, %v2756_v50 }
 0x240   :  { %2389 = vmatpush3.bf16.msra.mxu1 %v2696_v43  ;;  %v1394_v59 = vand.u32 4294901760, %v2759_v39 }
 0x242   :  { %v1395_v4 = vsub.f32 %v2759_v39, %v1394_v59 }
 0x243   :  { %2229 = vmatmul.mubr.f32.vlgmr.msra.gmra.mrb[0].mxu1 %v2656_v10  ;;  %v1285_v10 = vld [vmem:[%s2853_s5 + $0x18] sm:$0xff]  ;;  %s2533_s5 = smov [#allocation2]  }
 0x244   :  { %2231 = vmatprep.mubr.f32.mxu1 %v2660_v14  ;;  %v1396_v5 = vand.u32 4294901760, %v1395_v4  ;;  %v1321_v16 = vsel %vm1310_vm9, %v1285_v10, 0  ;;  %s1958_s13 = sshll.u32 %s2533_s5, 4  ;;  %s1959_s13 = int_to_ptr.vmem [resolvable:$true] %s1958_s13 }
 0x245   :  { %v2784_v22 = vand.u32 4294901760, %v1321_v16  ;;  %s2506_s14 = scalar_lea.vmem %s1959_s13, 512  ;;  %p2511_p1 = scmp.lt.s32.totalorder %s1959_s13, %s1959_s13 }
 0x246   :  { %2242 = vmatprep.mubr.f32.mxu0 %v1396_v5  ;;  %v1416_v5 = vand.u32 4294901760, %v1415_v60  ;;  %p2507_p0 = scmp.ne.s32.totalorder %s1959_s13, %s2506_s14  ;;  %p2512_p2 = scmp.lt.s32.totalorder %s2506_s14, %s2506_s14 }
 0x247   :  { %2232 = vmatmul.mubr.f32.gmra.mrb[2].mxu1 %v2667_v20  ;;  %v2782_v20 = vsub.f32 %v1315_v8, %v2776_v12  ;;  %v2791_v37 = vsub.f32 %v1321_v16, %v2784_v22 }
 0x248   :  { %p2513_p3 = por %p2512_p2, %p2511_p1 }
 0x249   :  { %v1404_v34 = vand.u32 4294901760, %v2782_v20  ;;  %v1424_v54 = vand.u32 4294901760, %v2791_v37 }
 0x24a   :  { %p2514_p4 = pnand %p2513_p3, %p2507_p0 }
 0x24b   :  { %v1405_v49 = vsub.f32 %v2782_v20, %v1404_v34  ;;  %v1425_v42 = vsub.f32 %v2791_v37, %v1424_v54 }
 0x24d   :  { %v1406_v2 = vand.u32 4294901760, %v1405_v49 }
 0x316   :  { %v2230_v14 = vpop.f32.mrb[0].mxu1 }
 0x317   :  { %v2440_v17 = vadd.f32 %v2230_v14, %v605_v13  ;;  %v1248_v18 = vpop.f32.mrb[1].mxu1 }
 0x318   :  { %v2441_v19 = vadd.f32 %v1248_v18, %v600_v11  ;;  %v1426_v11 = vand.u32 4294901760, %v1425_v42 }
 0x319   :  { %vm1271_vm10 = vcmp.gt.f32.partialorder %v2440_v17, 0.0  ;;  %v1275_v21 = vmul.f32 0.2, %v2440_v17 }
 0x31a   :  { %vm1270_vm11 = vcmp.gt.f32.partialorder %v2441_v19, 0.0  ;;  %v1274_v24 = vmul.f32 0.2, %v2441_v19  ;;  %v2233_v25 = vpop.f32.mrb[2].mxu1 }
 0x31b   :  { %v1279_v28 = vsel %vm1271_vm10, %v2440_v17, %v1275_v21  ;;  %v2442_v29 = vadd.f32 %v2233_v25, %v615_v23  ;;  %v1260_v30 = vpop.f32.mrb[3].mxu1 }
 0x31c   :  { %v1327_v31 = vand.u32 4294901760, %v1279_v28  ;;  %v1278_v32 = vsel %vm1270_vm11, %v2441_v19, %v1274_v24  ;;  %v2443_v33 = vadd.f32 %v1260_v30, %v610_v27 }
 0x31d   :  { %v1324_v35 = vand.u32 4294901760, %v1278_v32  ;;  %vm1273_vm12 = vcmp.gt.f32.partialorder %v2442_v29, 0.0  ;;  %v1277_v36 = vmul.f32 0.2, %v2442_v29 }
 0x31e   :  { %v1441_v38 = vsub.f32 %v1279_v28, %v1327_v31  ;;  %vm1272_vm13 = vcmp.gt.f32.partialorder %v2443_v33, 0.0  ;;  %v1276_v40 = vmul.f32 0.2, %v2443_v33 }
 0x31f   :  { %v2794_v43 = vpack.c.bf16 %v1327_v31, %v1324_v35  ;;  %v1434_v44 = vsub.f32 %v1278_v32, %v1324_v35  ;;  %v1281_v45 = vsel %vm1273_vm12, %v2442_v29, %v1277_v36 }
 0x320   :  { %v1333_v47 = vand.u32 4294901760, %v1281_v45  ;;  %v1280_v48 = vsel %vm1272_vm13, %v2443_v33, %v1276_v40  ;;  %v1442_v51 = vand.u32 4294901760, %v1441_v38 }
 0x321   :  { %v1330_v52 = vand.u32 4294901760, %v1280_v48  ;;  %2391 = vmatprep.subr.bf16.mxu0 %v2794_v43  ;;  %v1435_v53 = vand.u32 4294901760, %v1434_v44  ;;  %v2406_v55 = vpack.c.bf16 %v1441_v38, %v1434_v44 }
 0x322   :  { %v1455_v57 = vsub.f32 %v1281_v45, %v1333_v47  ;;  %2393 = vmatpush3.bf16.msra.mxu0 %v2794_v43  ;;  %v1443_v58 = vsub.f32 %v1441_v38, %v1442_v51 }
 0x323   :  { %v2394_v61 = vpack.c.bf16 %v1333_v47, %v1330_v52  ;;  %v1448_v62 = vsub.f32 %v1280_v48, %v1330_v52  ;;  %v1436_v0 = vsub.f32 %v1434_v44, %v1435_v53  ;;  %v2422_v1 = vpack.c.bf16 %v1442_v51, %v1435_v53 }
 0x324   :  { %v1444_v3 = vand.u32 4294901760, %v1443_v58  ;;  %v1456_v56 = vand.u32 4294901760, %v1455_v57 }
 0x325   :  { %2395 = vmatprep.subr.bf16.mxu0 %v2394_v61  ;;  %v1437_v63 = vand.u32 4294901760, %v1436_v0  ;;  %v1449_v46 = vand.u32 4294901760, %v1448_v62  ;;  %v2410_v4 = vpack.c.bf16 %v1455_v57, %v1448_v62 }
 0x326   :  { %2397 = vmatpush3.bf16.msra.mxu0 %v2394_v61  ;;  %v1457_v6 = vsub.f32 %v1455_v57, %v1456_v56 }
 0x327   :  { %v2398_v7 = vpack.c.bf16 %v1444_v3, %v1437_v63  ;;  %v1450_v8 = vsub.f32 %v1448_v62, %v1449_v46  ;;  %v2426_v9 = vpack.c.bf16 %v1456_v56, %v1449_v46 }
 0x328   :  { %v1458_v10 = vand.u32 4294901760, %v1457_v6 }
 0x329   :  { %2243 = vmatmul.mubr.f32.vlgmr.msra.gmra.mrb[2].mxu0 %v1406_v2  ;;  %2399 = vmatprep.subr.bf16.mxu0 %v2398_v7  ;;  %v1451_v13 = vand.u32 4294901760, %v1450_v8 }
 0x32a   :  { %2401 = vmatpush3.bf16.msra.mxu0 %v2398_v7  ;;  %2245 = vmatprep.mubr.f32.mxu0 %v1416_v5 }
 0x32b   :  { %v2402_v14 = vpack.c.bf16 %v1458_v10, %v1451_v13 }
 0x32d   :  { %2246 = vmatmul.mubr.f32.gmra.mrb[4].mxu0 %v1426_v11  ;;  %2403 = vmatprep.subr.bf16.mxu0 %v2402_v14 }
 0x32e   :  { %2405 = vmatpush3.bf16.msra.mxu0 %v2402_v14  ;;  %2256 = vmatprep.mubr.f32.mxu0 %v2756_v50 }
 0x32f   :  { %2407 = vmatprep.subr.bf16.mxu0 %v2406_v55 }
 0x331   :  { %2257 = vmatmul.mubr.f32.vlgmr.msra.gmra.mrb[2].mxu0 %v2776_v12 }
 0x332   :  { %2409 = vmatpush3.bf16.msra.mxu0 %v2406_v55  ;;  %2259 = vmatprep.mubr.f32.mxu0 %v2778_v15 }
 0x333   :  { %2411 = vmatprep.subr.bf16.mxu0 %v2410_v4 }
 0x335   :  { %2260 = vmatmul.mubr.f32.gmra.mrb[4].mxu0 %v2784_v22 }
 0x336   :  { %2413 = vmatpush3.bf16.msra.mxu0 %v2410_v4  ;;  %2270 = vmatprep.mubr.f32.mxu0 %v2759_v39  ;;  %v1298_v39 = vpop.permute.xlu0 %1297 }
 0x337   :  { %2415 = vmatprep.subr.bf16.mxu0 %v2794_v43 }
 0x339   :  { %2271 = vmatmul.mubr.f32.vlgmr.msra.gmra.mrb[2].mxu0 %v2782_v20 }
 0x33a   :  { %2417 = vmatpush3.bf16.msra.mxu0 %v2794_v43  ;;  %2273 = vmatprep.mubr.f32.mxu0 %v2787_v26  ;;  %v1308_v21 = vpop.permute.xlu0 %1307 }
 0x33b   :  { %2419 = vmatprep.subr.bf16.mxu0 %v2394_v61 }
 0x33d   :  { %2274 = vmatmul.mubr.f32.gmra.mrb[4].mxu0 %v2791_v37 }
 0x33e   :  { %2421 = vmatpush3.bf16.msra.mxu0 %v2394_v61  ;;  %2284 = vmatprep.mubr.f32.mxu0 %v1394_v59  ;;  %v1293_v59 = vpop.permute.xlu1 %1292 }
 0x33f   :  { %2423 = vmatprep.subr.bf16.mxu0 %v2422_v1 }
 0x341   :  { %2285 = vmatmul.mubr.f32.vlgmr.msra.gmra.mrb[2].mxu0 %v1404_v34 }
 0x342   :  { %2425 = vmatpush3.bf16.msra.mxu0 %v2422_v1  ;;  %2287 = vmatprep.mubr.f32.mxu0 %v1414_v41  ;;  %v1303_v25 = vpop.permute.xlu1 %1302 }
 0x343   :  { %2427 = vmatprep.subr.bf16.mxu0 %v2426_v9 }
 0x345   :  { %2288 = vmatmul.mubr.f32.gmra.mrb[4].mxu0 %v1424_v54 }
 0x346   :  { %2429 = vmatpush3.bf16.msra.mxu0 %v2426_v9  ;;  %2298 = vmatprep.mubr.f32.mxu0 %v2756_v50 }
 0x347   :  { %2431 = vmatprep.subr.bf16.mxu0 %v2794_v43 }
 0x349   :  { %2299 = vmatmul.mubr.f32.vlgmr.msra.gmra.mrb[2].mxu0 %v2776_v12 }
 0x34a   :  { %2433 = vmatpush3.bf16.msra.mxu0 %v2794_v43  ;;  %2301 = vmatprep.mubr.f32.mxu0 %v2778_v15 }
 0x34b   :  { %2435 = vmatprep.subr.bf16.mxu0 %v2394_v61 }
 0x34d   :  { %2302 = vmatmul.mubr.f32.gmra.mrb[4].mxu0 %v2784_v22 }
 0x34e   :  { %2437 = vmatpush3.bf16.msra.mxu0 %v2394_v61  ;;  %2312 = vmatprep.mubr.f32.mxu0 %v2756_v50 }
 0x351   :  { %2313 = vmatmul.mubr.f32.vlgmr.msra.gmra.mrb[2].mxu0 %v2776_v12 }
 0x352   :  { %2315 = vmatprep.mubr.f32.mxu0 %v2778_v15 }
 0x355   :  { %2316 = vmatmul.mubr.f32.gmra.mrb[4].mxu0 %v2784_v22 }
 0x424   :  { %v2314_v16 = vpop.f32.mrb[2].mxu0 }
 0x425   :  { %v2444_v17 = vadd.f32 %v2314_v16, %v1298_v39  ;;  %v1915_v18 = vpop.f32.mrb[3].mxu0 }
 0x426   :  { %v2445_v19 = vadd.f32 %v1915_v18, %v1293_v59 }
 0x427   :  { %vm1938_vm14 = vcmp.gt.f32.partialorder %v2444_v17, 0.0  ;;  %v1942_v20 = vmul.f32 0.2, %v2444_v17 }
 0x428   :  { %vm1937_vm15 = vcmp.gt.f32.partialorder %v2445_v19, 0.0  ;;  %v1941_v23 = vmul.f32 0.2, %v2445_v19  ;;  %v2317_v24 = vpop.f32.mrb[4].mxu0 }
 0x429   :  { %v1946_v50 = vsel %vm1938_vm14, %v2444_v17, %v1942_v20  ;;  %v2446_v26 = vadd.f32 %v2317_v24, %v1308_v21  ;;  %v1927_v12 = vpop.f32.mrb[5].mxu0 }
 0x42a   :  { %1950 = vst.msk [vmem:[#allocation2 + $0x8] sm:$0xff] %vm1310_vm9, %v1946_v50  ;;  %v1945_v15 = vsel %vm1937_vm15, %v2445_v19, %v1941_v23  ;;  %v2447_v22 = vadd.f32 %v1927_v12, %v1303_v25 }
 0x42b   :  { %1949 = vst.msk [vmem:[#allocation2] sm:$0xff] %vm1310_vm9, %v1945_v15  ;;  %vm1940_vm0 = vcmp.gt.f32.partialorder %v2446_v26, 0.0  ;;  %v1944_v27 = vmul.f32 0.2, %v2446_v26 }
 0x42c   :  { %vm1939_vm1 = vcmp.gt.f32.partialorder %v2447_v22, 0.0  ;;  %v1943_v28 = vmul.f32 0.2, %v2447_v22 }
 0x42d   :  { %v1948_v29 = vsel %vm1940_vm0, %v2446_v26, %v1944_v27 }
 0x42e   :  { %1952 = vst.msk [vmem:[#allocation2 + $0x18] sm:$0xff] %vm1310_vm9, %v1948_v29  ;;  %v1947_v30 = vsel %vm1939_vm1, %v2447_v22, %v1943_v28 }
 0x42f   :  { %1951 = vst.msk [vmem:[#allocation2 + $0x10] sm:$0xff] %vm1310_vm9, %v1947_v30 }
 0x430   :  { %2517 = shalt.err (!%p2514_p4)
}
 0x431   :  { %s2518_s17 = scalar_lea.hbm %s2855_s7, 512 }
 0x432   :  { %p2519_p5 = scmp.ne.s32.totalorder %s2855_s7, %s2518_s17  ;;  %p2522_p6 = scmp.lt.u32.totalorder %s2518_s17, %s2855_s7 }
 0x434   :  { %p2524_p7 = pnand %p2522_p6, %p2519_p5 }
 0x436   :  { %2527 = shalt.err (!%p2524_p7)
}
 0x437   :  { %s2534_s22 = smov 128   ;;  %s2535_s23 = smov 8  }
 0x438   :  { %1964 = dma.vmem_to_hbm [thread:$0]  %s1959_s13, 512, %s2855_s7, [#allocation3], %s2534_s22, %s2534_s22, %s2535_s23  }
 0x439   :  { %2528 = dma.done.wait [#allocation3], 512  }
 0x43a   :  { %2529 = vsyncadd [#allocation3], 4294966784 }
 0x43b   :  { %1968 = vsyncpa [#allocation3], 1 }

</bundles_post_ra>
